<compile_context>
chip_gen: v5e
topology: v5e:2x2
jax: 0.10.0
libtpu: 0.0.40
codegen_flags: <defaults>
</compile_context>

<pallas_src>
import functools
import math

import jax
import jax.numpy as jnp
from jax.experimental import pallas as pl
from jax.experimental.pallas import tpu as pltpu


# ----------------------------- kernels -------------------------------------


def _layer_norm(x, g, b, eps=1e-6):
    mu = jnp.mean(x, axis=-1, keepdims=True)
    var = jnp.mean((x - mu) ** 2, axis=-1, keepdims=True)
    return (x - mu) * jax.lax.rsqrt(var + eps) * g + b


def embed_norm_kernel(emb_ref, pos_ref, g_ref, b_ref, o_ref):
    # enc = LayerNorm(dropout(pos_enc(emb)));  dropout == identity (eval mode).
    x = emb_ref[0] + pos_ref[...]                          # (tq, D) f32
    o_ref[0] = _layer_norm(x, g_ref[...], b_ref[...]).astype(o_ref.dtype)


def encoder_layer_kernel(x_ref, mask_ref,
                         wq_ref, wkv_ref, wo_ref,
                         g1_ref, be1_ref,
                         w1_ref, bb1_ref, w2_ref, bb2_ref,
                         g2_ref, be2_ref,
                         o_ref, kv_scr, *, head_num, dim_mid):
    """One SequenceMappingLayer: post-norm MHA + post-norm FFN (d_k=d_v=dim_mid).

    x_ref   : (1, S, D)  bf16 full-sequence activations (query tile sliced inside)
    mask_ref: (1, 1, S)  f32 pad mask (1.0 keep / 0.0 pad)
    wq_ref  : (D, H*dk)  bf16   wkv_ref: (D, 2*H*dk) bf16 (K | V)   wo_ref: (H*dk, D) bf16
    kv_scr  : (2H, S, dk) bf16 VMEM scratch — head-major K|V, computed once per
              batch element (qi == 0) and reused by every query tile.
    """
    H, dk = head_num, dim_mid
    hdk = H * dk
    S = x_ref.shape[1]
    tq = o_ref.shape[1]
    scale = 1.0 / math.sqrt(dk)
    qi = pl.program_id(1)

    # ---- K|V projection: once per batch element, cached head-major in VMEM ----
    @pl.when(qi == 0)
    def _():
        kv = jnp.dot(x_ref[0], wkv_ref[...],
                     preferred_element_type=jnp.float32)      # (S, 2*H*dk) f32
        kv_scr[...] = (kv.astype(jnp.bfloat16)
                         .reshape(S, 2 * H, dk)
                         .transpose(1, 0, 2))                 # (2H, S, dk) bf16

    # ---- query tile sliced from the (single) full-sequence block ----
    start = pl.multiple_of(qi * tq, tq)
    xq = x_ref[0, pl.ds(start, tq), :]                        # (tq, D) bf16

    # additive pad-mask bias, computed once per block (not per head)
    bias = jnp.where(mask_ref[0] == 0.0, -1e9, 0.0)           # (1, S) f32

    # ---- fused Q projection (bf16 in / f32 accumulate), head-major layout ----
    q = jnp.dot(xq, wq_ref[...], preferred_element_type=jnp.float32)
    q3 = q.astype(jnp.bfloat16).reshape(tq, H, dk).transpose(1, 0, 2)   # (H, tq, dk)

    kv_hm = kv_scr[...]                                       # (2H, S, dk) bf16
    k3 = kv_hm[:H]                                            # (H, S, dk)
    v3 = kv_hm[H:]                                            # (H, S, dk)

    # ---- batched scores / softmax / PV over heads (no lane slicing) ----
    att = jnp.einsum("hqd,hkd->hqk", q3, k3,
                     preferred_element_type=jnp.float32) * scale        # (H, tq, S)
    att = att + bias[None, :, :]
    att = att - jnp.max(att, axis=-1, keepdims=True)
    p = jnp.exp(att)
    p = p * pl.reciprocal(jnp.sum(p, axis=-1, keepdims=True), approx=True)

    pv = jnp.einsum("hqk,hkd->hqd", p.astype(jnp.bfloat16), v3,
                    preferred_element_type=jnp.float32)                 # (H, tq, dk)

    # ---- fused output projection ----
    attn = pv.transpose(1, 0, 2).reshape(tq, hdk)                       # (tq, H*dk) f32
    attn = jnp.dot(attn.astype(jnp.bfloat16), wo_ref[...],
                   preferred_element_type=jnp.float32)                  # (tq, D) f32

    x1 = _layer_norm(attn + xq.astype(jnp.float32), g1_ref[...], be1_ref[...])

    # ---- position-wise feed forward (bf16 matmuls, f32 accumulate) ----
    h1 = jnp.maximum(
        jnp.dot(x1.astype(jnp.bfloat16), w1_ref[...],
                preferred_element_type=jnp.float32) + bb1_ref[...], 0.0)
    ff = jnp.dot(h1.astype(jnp.bfloat16), w2_ref[...],
                 preferred_element_type=jnp.float32) + bb2_ref[...]
    o_ref[0] = _layer_norm(ff + x1, g2_ref[...], be2_ref[...]).astype(o_ref.dtype)


# ----------------------------- wrappers ------------------------------------


def _pick_q_tile(S):
    # Cap at 256 so the (tq, S) score tile + full-seq block fit v7x's 64 MiB VMEM.
    for t in (256, 128):
        if S % t == 0:
            return t
    # TODO(synk): non-multiple-of-tile sequence lengths fall back to a single
    # full-S tile; long awkward S would need a cdiv grid with a masked tail tile.
    return S


_VMEM_LIMIT = 48 * 1024 * 1024   # explicit scoped-VMEM limit (safe on v5e/v6e/v7x)


def embed_norm(emb, pos, g, b, *, tq):
    B, S, D = emb.shape
    nq = S // tq
    return pl.pallas_call(
        embed_norm_kernel,
        out_shape=jax.ShapeDtypeStruct((B, S, D), jnp.bfloat16),
        grid=(B, nq),
        in_specs=[
            pl.BlockSpec((1, tq, D), lambda bi, qi: (bi, qi, 0)),
            pl.BlockSpec((tq, D), lambda bi, qi: (qi, 0)),
            pl.BlockSpec((1, D), lambda bi, qi: (0, 0)),
            pl.BlockSpec((1, D), lambda bi, qi: (0, 0)),
        ],
        out_specs=pl.BlockSpec((1, tq, D), lambda bi, qi: (bi, qi, 0)),
        compiler_params=pltpu.CompilerParams(
            dimension_semantics=("parallel", "parallel"),
            vmem_limit_bytes=_VMEM_LIMIT),
    )(emb, pos, g, b)


def encoder_layer(x, mask, lp, *, head_num, dim_mid, tq, out_dtype):
    B, S, D = x.shape
    hdk = head_num * dim_mid
    F = lp["w1"].shape[1]
    nq = S // tq

    def const(shape):
        n = len(shape)
        return pl.BlockSpec(shape, lambda bi, qi, _n=n: (0,) * _n)

    kern = functools.partial(encoder_layer_kernel,
                             head_num=head_num, dim_mid=dim_mid)
    return pl.pallas_call(
        kern,
        out_shape=jax.ShapeDtypeStruct((B, S, D), out_dtype),
        grid=(B, nq),
        in_specs=[
            pl.BlockSpec((1, S, D), lambda bi, qi: (bi, 0, 0)),    # full seq (bf16)
            pl.BlockSpec((1, 1, S), lambda bi, qi: (bi, 0, 0)),    # pad mask
            const((D, hdk)),          # wq  (bf16)
            const((D, 2 * hdk)),      # wkv (bf16)
            const((hdk, D)),          # wo  (bf16)
            const((1, D)), const((1, D)),       # ln1 g, b
            const((D, F)), const((1, F)),       # w1 (bf16), b1
            const((F, D)), const((1, D)),       # w2 (bf16), b2
            const((1, D)), const((1, D)),       # ln2 g, b
        ],
        out_specs=pl.BlockSpec((1, tq, D), lambda bi, qi: (bi, qi, 0)),
        scratch_shapes=[pltpu.VMEM((2 * head_num, S, dim_mid), jnp.bfloat16)],
        compiler_params=pltpu.CompilerParams(
            # qi carries the cached K|V scratch -> "arbitrary"; B stays parallel
            dimension_semantics=("parallel", "arbitrary"),
            vmem_limit_bytes=_VMEM_LIMIT),
    )(x, mask,
      lp["wq"], lp["wkv"], lp["wo"],
      lp["ln1_g"], lp["ln1_b"],
      lp["w1"], lp["b1"], lp["w2"], lp["b2"],
      lp["ln2_g"], lp["ln2_b"])


def encoder_forward(x_seq, x_seq_mask, params, *, head_num, dim_mid):
    B, S = x_seq.shape
    tq = _pick_q_tile(S)
    # Embedding lookup + positional-table slice are glue (pure gathers/slices).
    emb = jnp.take(params["emb_table"], x_seq, axis=0)          # (B, S, D) f32
    pos = params["pos_table"][:S]                               # (S, D)  f32
    enc = embed_norm(emb, pos, params["ln0_g"], params["ln0_b"], tq=tq)  # bf16
    n_layers = len(params["layers"])
    for i, lp in enumerate(params["layers"]):
        out_dtype = jnp.float32 if i == n_layers - 1 else jnp.bfloat16
        enc = encoder_layer(enc, x_seq_mask, lp,
                            head_num=head_num, dim_mid=dim_mid,
                            tq=tq, out_dtype=out_dtype)
    return enc


# --------------------------- deterministic init -----------------------------


def _uniform(key, shape, fan_in):
    bound = 1.0 / math.sqrt(fan_in)
    return jax.random.uniform(key, shape, jnp.float32, -bound, bound)


def init_params(key, x_values_num, n_layers, head_num, dim_mid, dim_x,
                ff_hiden_dim, pad_idx, n_position=200):
    k_emb, k_layers = jax.random.split(key)
    emb = jax.random.normal(k_emb, (x_values_num, dim_x), jnp.float32)
    emb = emb.at[pad_idx].set(0.0)                      # padding_idx row zeroed

    # sinusoidal positional table (SettledPositionalEncoding)
    pos = jnp.arange(n_position, dtype=jnp.float32)[:, None]
    idx = jnp.arange(dim_x)[None, :]
    angle = pos / jnp.power(10000.0, (2.0 * (idx // 2)) / dim_x)
    pos_table = jnp.where(idx % 2 == 0, jnp.sin(angle), jnp.cos(angle))
    pos_table = pos_table.astype(jnp.float32)           # (n_position, dim_x)

    D, dk, H, F = dim_x, dim_mid, head_num, ff_hiden_dim
    layers = []
    lkeys = jax.random.split(k_layers, n_layers)
    for lk in lkeys:
        ks = jax.random.split(lk, 8)
        wq = _uniform(ks[0], (D, H * dk), D)
        wk = _uniform(ks[1], (D, H * dk), D)
        wv = _uniform(ks[2], (D, H * dk), D)
        wo = _uniform(ks[3], (H * dk, D), H * dk)
        layers.append(dict(
            # matmul weights stored in bf16 (MXU-native); accumulation is f32
            wq=wq.astype(jnp.bfloat16),                          # (D, H*dk)
            wkv=jnp.concatenate([wk, wv], axis=1).astype(jnp.bfloat16),  # (D, 2*H*dk)
            wo=wo.astype(jnp.bfloat16),                          # (H*dk, D)
            ln1_g=jnp.ones((1, D), jnp.float32),
            ln1_b=jnp.zeros((1, D), jnp.float32),
            w1=_uniform(ks[4], (D, F), D).astype(jnp.bfloat16),
            b1=_uniform(ks[5], (1, F), D),
            w2=_uniform(ks[6], (F, D), F).astype(jnp.bfloat16),
            b2=_uniform(ks[7], (1, D), F),
            ln2_g=jnp.ones((1, D), jnp.float32),
            ln2_b=jnp.zeros((1, D), jnp.float32),
        ))

    return dict(
        emb_table=emb,
        pos_table=pos_table,
        ln0_g=jnp.ones((1, D), jnp.float32),
        ln0_b=jnp.zeros((1, D), jnp.float32),
        layers=layers,
    )


# --------------------------------- main -------------------------------------

if __name__ == "__main__":
    # Small shapes consistent with the module signature.
    x_values_num, n_layers, head_num = 16, 2, 2
    dim_mid, dim_x, ff_hiden_dim, pad_idx = 16, 32, 64, 0
    B, S = 2, 8

    key = jax.random.PRNGKey(0)
    k_param, k_seq = jax.random.split(key)
    params = init_params(k_param, x_values_num, n_layers, head_num,
                         dim_mid, dim_x, ff_hiden_dim, pad_idx)

    x_seq = jax.random.randint(k_seq, (B, S), 1, x_values_num, dtype=jnp.int32)
    x_seq = x_seq.at[0, -2:].set(pad_idx)               # introduce some padding
    x_seq_mask = (x_seq != pad_idx).astype(jnp.float32)[:, None, :]   # (B, 1, S)

    out = encoder_forward(x_seq, x_seq_mask, params,
                          head_num=head_num, dim_mid=dim_mid)
    jax.block_until_ready(out)
    assert out.shape == (B, S, dim_x)
    assert out.dtype == jnp.float32
    assert bool(jnp.all(jnp.isfinite(out)))
    print("KERNEL_OK")
</pallas_src>

<mosaic_0001>
module attributes {stable_mosaic.version = 11 : i64} {
  func.func @embed_norm_kernel(%arg0: i32, %arg1: i32, %arg2: memref<1x8x32xf32, #tpu.memory_space<vmem>>, %arg3: memref<8x32xf32, #tpu.memory_space<vmem>>, %arg4: memref<1x32xf32, #tpu.memory_space<vmem>>, %arg5: memref<1x32xf32, #tpu.memory_space<vmem>>, %arg6: memref<1x8x32xbf16, #tpu.memory_space<vmem>>) attributes {dimension_semantics = [#tpu.dimension_semantics<parallel>, #tpu.dimension_semantics<parallel>], iteration_bounds = array<i64: 2, 1>, scalar_prefetch = 0 : i64, scratch_operands = 0 : i64, tpu.core_type = #tpu.core_type<tc>, window_params = [{transform_indices = @transform_0, window_bounds = array<i64: 1, 8, 32>}, {transform_indices = @transform_1, window_bounds = array<i64: 8, 32>}, {pipeline_mode = #tpu.pipeline_mode<synchronous>, transform_indices = @transform_2, window_bounds = array<i64: 1, 32>}, {pipeline_mode = #tpu.pipeline_mode<synchronous>, transform_indices = @transform_3, window_bounds = array<i64: 1, 32>}, {transform_indices = @transform_4, window_bounds = array<i64: 1, 8, 32>}]} {
    %c0 = arith.constant 0 : index
    %c0_0 = arith.constant 0 : index
    %c0_1 = arith.constant 0 : index
    %0 = vector.load %arg2[%c0, %c0_0, %c0_1] : memref<1x8x32xf32, #tpu.memory_space<vmem>>, vector<1x8x32xf32>
    %1 = vector.shape_cast %0 : vector<1x8x32xf32> to vector<8x32xf32>
    %c0_2 = arith.constant 0 : index
    %c0_3 = arith.constant 0 : index
    %2 = vector.load %arg3[%c0_2, %c0_3] : memref<8x32xf32, #tpu.memory_space<vmem>>, vector<8x32xf32>
    %3 = arith.addf %1, %2 : vector<8x32xf32>
    %c0_4 = arith.constant 0 : index
    %c0_5 = arith.constant 0 : index
    %4 = vector.load %arg4[%c0_4, %c0_5] : memref<1x32xf32, #tpu.memory_space<vmem>>, vector<1x32xf32>
    %c0_6 = arith.constant 0 : index
    %c0_7 = arith.constant 0 : index
    %5 = vector.load %arg5[%c0_6, %c0_7] : memref<1x32xf32, #tpu.memory_space<vmem>>, vector<1x32xf32>
    %cst = arith.constant dense<0.000000e+00> : vector<8xf32>
    %6 = vector.multi_reduction <add>, %3, %cst [1] : vector<8x32xf32> to vector<8xf32>
    %7 = vector.shape_cast %6 : vector<8xf32> to vector<8x1xf32>
    %cst_8 = arith.constant 3.200000e+01 : f32
    %8 = vector.broadcast %cst_8 : f32 to vector<8x1xf32>
    %9 = arith.divf %7, %8 : vector<8x1xf32>
    %10 = vector.broadcast %9 : vector<8x1xf32> to vector<8x32xf32>
    %11 = arith.subf %3, %10 : vector<8x32xf32>
    %12 = arith.mulf %11, %11 : vector<8x32xf32>
    %cst_9 = arith.constant dense<0.000000e+00> : vector<8xf32>
    %13 = vector.multi_reduction <add>, %12, %cst_9 [1] : vector<8x32xf32> to vector<8xf32>
    %14 = vector.shape_cast %13 : vector<8xf32> to vector<8x1xf32>
    %cst_10 = arith.constant 3.200000e+01 : f32
    %15 = vector.broadcast %cst_10 : f32 to vector<8x1xf32>
    %16 = arith.divf %14, %15 : vector<8x1xf32>
    %17 = vector.broadcast %9 : vector<8x1xf32> to vector<8x32xf32>
    %18 = arith.subf %3, %17 : vector<8x32xf32>
    %cst_11 = arith.constant 9.99999997E-7 : f32
    %19 = vector.broadcast %cst_11 : f32 to vector<8x1xf32>
    %20 = arith.addf %16, %19 : vector<8x1xf32>
    %21 = math.rsqrt %20 : vector<8x1xf32>
    %22 = vector.broadcast %21 : vector<8x1xf32> to vector<8x32xf32>
    %23 = arith.mulf %18, %22 : vector<8x32xf32>
    %24 = vector.broadcast %4 : vector<1x32xf32> to vector<8x32xf32>
    %25 = arith.mulf %23, %24 : vector<8x32xf32>
    %26 = vector.broadcast %5 : vector<1x32xf32> to vector<8x32xf32>
    %27 = arith.addf %25, %26 : vector<8x32xf32>
    %28 = arith.truncf %27 : vector<8x32xf32> to vector<8x32xbf16>
    %c0_12 = arith.constant 0 : index
    %c0_13 = arith.constant 0 : index
    %c0_14 = arith.constant 0 : index
    %29 = vector.load %arg6[%c0_12, %c0_13, %c0_14] : memref<1x8x32xbf16, #tpu.memory_space<vmem>>, vector<1x8x32xbf16>
    %30 = vector.shape_cast %29 : vector<1x8x32xbf16> to vector<8x32xbf16>
    %31 = vector.shape_cast %28 : vector<8x32xbf16> to vector<1x8x32xbf16>
    tpu.vector_store %arg6[%c0_12, %c0_13, %c0_14], %31 {strides = array<i32>} : memref<1x8x32xbf16, #tpu.memory_space<vmem>>, vector<1x8x32xbf16>,
    return
  }
  func.func @transform_0(%arg0: i32, %arg1: i32) -> (i32, i32, i32) {
    %c0_i32 = arith.constant 0 : i32
    %c0_i32_0 = arith.constant 0 : i32
    return %arg0, %arg1, %c0_i32 : i32, i32, i32
  }
  func.func @transform_1(%arg0: i32, %arg1: i32) -> (i32, i32) {
    %c0_i32 = arith.constant 0 : i32
    %c0_i32_0 = arith.constant 0 : i32
    return %arg1, %c0_i32 : i32, i32
  }
  func.func @transform_2(%arg0: i32, %arg1: i32) -> (i32, i32) {
    %c0_i32 = arith.constant 0 : i32
    %c0_i32_0 = arith.constant 0 : i32
    %c0_i32_1 = arith.constant 0 : i32
    return %c0_i32, %c0_i32_0 : i32, i32
  }
  func.func @transform_3(%arg0: i32, %arg1: i32) -> (i32, i32) {
    %c0_i32 = arith.constant 0 : i32
    %c0_i32_0 = arith.constant 0 : i32
    %c0_i32_1 = arith.constant 0 : i32
    return %c0_i32, %c0_i32_0 : i32, i32
  }
  func.func @transform_4(%arg0: i32, %arg1: i32) -> (i32, i32, i32) {
    %c0_i32 = arith.constant 0 : i32
    %c0_i32_0 = arith.constant 0 : i32
    return %arg0, %arg1, %c0_i32 : i32, i32, i32
  }
}

</mosaic_0001>

<bundles_post_ra>
// kernel: tpu_custom_call.1
= control target key start
LH: loop header
LB: loop body
LE: loop exit
PB: predicated region body
PF: predicated region fallthrough
CT: control target
= control target key end

     0   :  { %9 = vsyncpa [#allocation3], 0  ;;  %s837_s0 = inlined_call_operand.hbm [shape: f32[2,8,32], index: 0, kind: input, shape index: {}]   ;;  %s838_s1 = inlined_call_operand.hbm [shape: f32[8,32], index: 1, kind: input, shape index: {}]   ;;  %s839_s2 = inlined_call_operand.vmem [shape: f32[1,32], index: 2, kind: input, shape index: {}]   ;;  %s840_s3 = inlined_call_operand.vmem [shape: f32[1,32], index: 3, kind: input, shape index: {}]   ;;  %s841_s4 = inlined_call_operand.hbm [shape: bf16[2,8,32], index: 4, kind: output, shape index: {}]  }
   0x1   :  { %11 = vsyncpa [#allocation3 + $0x1], 0 }
   0x2   :  { %12 = vsyncpa [#allocation6], 0 }
   0x3   :  { %13 = vsyncpa [#allocation4], 0 }
   0x4   :  { %15 = vsyncpa [#allocation4 + $0x1], 0  ;;  %s679_s15 = smov 0   ;;  %s681_s16 = smov 0  }
   0x5   :  { %s683_s17 = smov 0   ;;  %s685_s18 = smov 0  }
   0x6   :  { %s687_s19 = smov 0   ;;  %s689_s20 = smov 0  }
   0x7 LB: > { %s409_s21 = sadd.s32 4294967295, %s650_s20   ;;  %s410_s22 = sadd.s32 4294967294, %s650_s20   ;;  %s650_s20 = sphi %s689_s20, %s21_s20   ;;  %s646_s19 = sphi %s687_s19, %s853_s19   ;;  %s642_s18 = sphi %s685_s18, %s852_s18   ;;  %s638_s17 = sphi %s683_s17, %s851_s17   ;;  %s634_s16 = sphi %s681_s16, %s850_s16   ;;  %s630_s15 = sphi %s679_s15, %s849_s15  }
   0x8   : > { %p55_p0 = scmp.ne.s32.totalorder %s634_s16, %s630_s15  ;;  %p713_p1 = scmp.eq.s32.totalorder %s409_s21, 0 }
   0x9   : > { %p717_p2 = scmp.eq.s32.totalorder %s409_s21, 1  ;;  %p155_p3 = scmp.eq.s32.totalorder %s410_s22, 1 }
   0xa   : > { %p723_p4 = por %p713_p1, %p55_p0  ;;  %p411_p5 = scmp.ge.s32.totalorder %s650_s20, 1 }
   0xb   : > { %p728_p6 = por %p155_p3, %p55_p0  ;;  %p162_p7 = scmp.lt.s32.totalorder %s650_s20, 3 }
   0xc   : > { %s176_s29 = sshll.u32 %s838_s1, 4  ;;  %p413_p9 = scmp.ge.s32.totalorder %s650_s20, 2  ;;  %s177_s29 = int_to_ptr.hbm [resolvable:$true] %s176_s29 }
   0xd   : > { %p736_p8 = pnand %p411_p5, %p162_p7  ;;  %s652_s5 = smov [#allocation5]  }
   0xe   : > { %s178_s6 = sshll.u32 %s652_s5, 4  ;;  %s33_s7 = sadd.s32 1, %s646_s19  ;;  %s179_s6 = int_to_ptr.vmem [resolvable:$true] %s178_s6 }
   0xf   : > { %p432_p10 = pneg %p736_p8  ;;  %p35_p12 = scmp.ge.s32.totalorder %s33_s7, 2 }
  0x10   : > { %s42_s8 = sadd.s32 1, %s638_s17  ;;  %p49_p13 = scmp.ne.s32.totalorder %s638_s17, %s634_s16 }
  0x11   : > { %p433_p11 = pnand %p432_p10, %p713_p1  ;;  %p50_p0 = scmp.eq.s32.totalorder %s650_s20, 0 }
  0x12   : > { %s855_s7 = smov (%p35_p12, %s33_s7), 0  ;;  %p758_p5 = por %p717_p2, %p49_p13 }
  0x13   : > { %435 = dma.hbm_to_vmem [thread:$0]  (!%p433_p11), %s177_s29, 128, %s179_s6, [#allocation6]  }
  0x14   : > { %p752_p3 = por %p50_p0, %p49_p13  ;;  %s37_s11 = ssub.s32 %s646_s19, %s855_s7 }
  0x15   : > { %p445_p7 = scmp.lt.s32.totalorder %s650_s20, 2  ;;  %p40_p10 = scmp.eq.s32.totalorder %s37_s11, 0 }
  0x16   : > { %s195_s12 = sand.u32 1, %s638_s17   ;;  %s415_s21 = sshll.u32 %s646_s19, 3 }
  0x17   : > { %s414_s13 = sshll.u32 %s195_s12, 3  ;;  %s204_s28 = scalar_lea.hbm %s837_s0, %s415_s21 }
  0x18   : > { %s767_s14 = scalar_select %p40_p10, %s638_s17, %s42_s8  }
  0x19   : > { %s199_s29 = scalar_lea.vmem [#allocation2], %s414_s13  ;;  %s206_s24 = sshll.u32 %s204_s28, 4  ;;  %s207_s24 = int_to_ptr.hbm [resolvable:$true] %s206_s24 }
  0x1a   : > { %s208_s5 = sshll.u32 %s199_s29, 4  ;;  %p437_p2 = pnand %p445_p7, %p752_p3  ;;  %s209_s5 = int_to_ptr.vmem [resolvable:$true] %s208_s5 }
  0x1b   : > { %s196_s6 = scalar_lea.sflag [#allocation3], %s195_s12  ;;  %217 = sbr.rel (%p736_p8) target bundleno = 311 (0x137), region = 36 }
  0x1c   : > { %439 = dma.hbm_to_vmem [thread:$0]  (!%p437_p2), %s207_s24, 128, %s209_s5, %s196_s6  }
  0x1d   : > { %s778_s8 = sand.u32 (!%p736_p8), 1, %s634_s16  }
  0x1e   : > { %s417_s11 = sshll.u32 (!%p736_p8), %s778_s8, 3  ;;  %s220_s21 = scalar_lea.sflag (!%p736_p8), [#allocation3], %s778_s8 }
  0x1f   : > { %s223_s13 = scalar_lea.vmem (!%p736_p8), [#allocation2], %s417_s11 }
  0x20   : > { %617 = dma.done.wait (%p723_p4), %s220_s21, 128  }
  0x21   : > { %619 = vsyncadd (%p723_p4), %s220_s21, 4294967168 }
  0x22   : > { %621 = dma.done.wait (%p713_p1), [#allocation6], 128  }
  0x23   : > { %623 = vsyncadd (%p713_p1), [#allocation6], 4294967168  ;;  %v254_v0 = vld [vmem:[%s223_s13] sm:$0xff]  ;;  %v255_v1 = vld [vmem:[#allocation5] sm:$0xff]  ;;  %vm259_vm0 = vcmask 261120   ;;  %v653_v4 = vmov 32.0  }
  0x24   : > { %v256_v2 = vadd.f32 %v255_v1, %v254_v0  ;;  %500 = vrcp.f32 %v653_v4  ;;  %s419_s23 = sshll.u32 %s778_s8, 2  ;;  %s421_s25 = sshll.u32 %s642_s18, 2  ;;  %v498_v25 = vld [vmem:[%s839_s2] ss:$0 sm:$0xff]  ;;  %vm298_vm5 = vcmask 257024  }
  0x25   : > { %v499_v27 = vld [vmem:[%s840_s3] ss:$0 sm:$0xff]  ;;  %s312_s29 = scalar_lea.hbm %s841_s4, %s421_s25  ;;  %s253_s5 = scalar_lea.vmem [#allocation7], %s419_s23 }
  0x26   : > { %v260_v3 = vsel %vm259_vm0, %v256_v2, 0.0  ;;  %s314_s18 = sshll.u32 %s253_s5, 4  ;;  %s316_s24 = sshll.u32 %s312_s29, 4  ;;  %s315_s18 = int_to_ptr.vmem [resolvable:$true] %s314_s18  ;;  %s317_s24 = int_to_ptr.hbm [resolvable:$true] %s316_s24 }
  0x27   : > { %261 = vadd.xlane.f32.xlu0 %v260_v3  ;;  %s301_s6 = scalar_lea.sflag [#allocation4], %s778_s8  ;;  %s578_s11 = sshra.s32 %s317_s24, 4  ;;  %s579_s11 = int_to_ptr.hbm [resolvable:$true] %s578_s11 }
  0x28   : > { %s580_s21 = scalar_lea.hbm %s579_s11, 4  ;;  %s584_s23 = scalar_lea.hbm %s841_s4, 8 }
  0x29   : > { %p581_p1 = scmp.ne.s32.totalorder %s579_s11, %s580_s21  ;;  %p585_p11 = scmp.lt.s32.totalorder %s579_s11, %s841_s4 }
  0x2a   : > { %v501_v5 = vpop.eup %500  ;;  %p586_p12 = scmp.lt.s32.totalorder %s584_s23, %s580_s21 }
  0x2b   : > { %v264_v6 = vmul.f32 32.0, %v501_v5  ;;  %vm268_vm1 = vweird.f32 %v501_v5  ;;  %p582_p4 = pnand %p581_p1, %p758_p5 }
  0x2c   : > { %p587_p13 = por %p586_p12, %p585_p11 }
  0x2d   : > { %v265_v7 = vsub.f32 1.0, %v264_v6  ;;  %p583_p8 = pneg %p582_p4 }
  0x2f   : > { %v266_v8 = vmul.f32 %v501_v5, %v265_v7  ;;  %p588_p0 = pnand %p587_p13, %p583_p8 }
  0x31   : > { %v267_v9 = vadd.f32 %v501_v5, %v266_v8 }
  0x33   : > { %v269_v10 = vsel %vm268_vm1, %v501_v5, %v267_v9 }
  0x9a   : > { %v262_v11 = vpop.xlane.xlu0 %261 }
  0x9b   : > { %v270_v12 = vmul.f32 %v269_v10, %v262_v11 }
  0x9d   : > { %v271_v13 = vsub.f32 %v256_v2, %v270_v12 }
  0x9f   : > { %v272_v14 = vmul.f32 %v271_v13, %v271_v13 }
  0xa1   : > { %v273_v15 = vsel %vm259_vm0, %v272_v14, 0.0 }
  0xa2   : > { %274 = vadd.xlane.f32.xlu0 %v273_v15 }
 0x115   : > { %v275_v16 = vpop.xlane.xlu0 %274 }
 0x116   : > { %v276_v17 = vmul.f32 %v275_v16, %v269_v10 }
 0x118   : > { %v277_v18 = vadd.f32 1e-06, %v276_v17 }
 0x11a   : > { %502 = vrsqrt.f32 %v277_v18  ;;  %vm284_vm3 = vweird.f32 %v277_v18 }
 0x120   : > { %v503_v19 = vpop.eup %502 }
 0x121   : > { %v279_v20 = vmul.f32 %v503_v19, %v277_v18  ;;  %vm285_vm2 = vweird.f32 %v503_v19 }
 0x122   : > { %vm286_vm4 = vmor %vm284_vm3, %vm285_vm2 }
 0x123   : > { %v280_v21 = vmul.f32 %v503_v19, %v279_v20 }
 0x125   : > { %v281_v22 = vmul.f32 0.5, %v280_v21 }
 0x127   : > { %v282_v23 = vsub.f32 1.5, %v281_v22 }
 0x129   : > { %v283_v24 = vmul.f32 %v503_v19, %v282_v23 }
 0x12b   : > { %v287_v26 = vsel %vm286_vm4, %v503_v19, %v283_v24 }
 0x12c   : > { %v288_v28 = vmul.f32 %v287_v26, %v271_v13 }
 0x12e   : > { %v292_v29 = vmul.f32 %v498_v25, %v288_v28 }
 0x130   : > { %v296_v30 = vadd.f32 %v499_v27, %v292_v29 }
 0x132   : > { %v297_v31 = vpack.c.bf16 %v296_v30, %v296_v30 }
 0x134   : > { %299 = vst.msk [vmem:[%s253_s5] sm:$0xf] %vm298_vm5, %v297_v31 }
 0x135   : > { %591 = shalt.err (!%p588_p0)
}
 0x136   : > { %430 = dma.vmem_to_hbm [thread:$0]  (%p758_p5), %s315_s18, 64, %s317_s24, %s301_s6  }
 0x137 PF: > { %s328_s8 = sand.u32 1, %s630_s15   ;;  %p441_p3 = pnand %p413_p9, %p728_p6 }
 0x138   : > { %s329_s12 = scalar_lea.sflag [#allocation4], %s328_s8 }
 0x139   : > { %p442_p7 = pneg %p441_p3 }
 0x13b   : > { %625 = dma.done.wait (%p442_p7), %s329_s12, 64  }
 0x13c   : > { %627 = vsyncadd (%p442_p7), %s329_s12, 4294967232  ;;  %s21_s20 = sadd.s32 1, %s650_s20   ;;  %s849_s15 = smov %s634_s16 }
 0x13d   : > { %p18_p10 = scmp.ge.s32.totalorder %s21_s20, 4   ;;  %s850_s16 = smov %s638_s17 }
 0x13e   : > { %s851_s17 = smov %s767_s14  ;;  %s852_s18 = smov %s646_s19 }
 0x13f   : > { %s853_s19 = smov %s855_s7  ;;  %20 = sbr.rel (!%p18_p10) target bundleno = 7 (0x7), region = 86 }
 0x144   :  { %335 = vsyncpa [#allocation3], 1 }
 0x145   :  { %337 = vsyncpa [#allocation3 + $0x1], 1 }
 0x146   :  { %338 = vsyncpa [#allocation6], 1 }
 0x147   :  { %339 = vsyncpa [#allocation4], 1 }
 0x148   :  { %341 = vsyncpa [#allocation4 + $0x1], 1 }

</bundles_post_ra>
